<compile_context>
chip_gen: v6e
topology: v6e:2x2x1
jax: 0.10.0
libtpu: 0.0.40
codegen_flags: <defaults>
</compile_context>

<pallas_src>
import jax
import jax.numpy as jnp
import numpy as np
from jax.experimental import pallas as pl
from jax.experimental.pallas import tpu as pltpu


def region_cross_entropy_loss(pred, target, *, max_tile_elems=256 * 1024):
    """RegionCrossEntropyLoss forward.

    pred   : (N, C, *spatial) float logits (f32 or bf16)
    target : (N, *spatial)    int class indices in [0, C)
    """
    N, C = pred.shape[0], pred.shape[1]
    S = int(np.prod(pred.shape[2:]))

    pred_f = pred.reshape(N, C, S)                    # keep native dtype
    tgt_f = target.reshape(N, S).astype(jnp.int32)

    itemsize = jnp.dtype(pred_f.dtype).itemsize

    # --- tile size: largest lane-dense tile that fits a v7x-safe VMEM budget ---
    # per-element working set: 2 buffers x (pred + tgt) + 2 x 2 resident f32
    # partials + ~6 f32 elementwise temps (m, se, xt, ce, union, valid).
    bytes_per_elem = 2 * (C * itemsize + 4) + 4 * 4 + 6 * 4
    budget = 36 << 20
    tile_cap = min(int(max_tile_elems), budget // bytes_per_elem)
    tile_cap = max(2048, (tile_cap // 2048) * 2048)   # multiple of 2048

    S_pad128 = -(-S // 128) * 128
    if S_pad128 >= tile_cap:
        tile_s = tile_cap
        S_work = S_pad128                             # pad only if S % 128 != 0
    else:
        tile_s = -(-S_pad128 // 2048) * 2048          # tiny input: one aligned tile
        S_work = tile_s

    if S_work != S:
        pred_f = jnp.pad(pred_f, ((0, 0), (0, 0), (0, S_work - S)))
        tgt_f = jnp.pad(tgt_f, ((0, 0), (0, S_work - S)))

    tsub = tile_s // 128
    S128 = S_work // 128
    n_tiles = -(-S128 // tsub)

    # Megacore split of the spatial reduction (second 'parallel' axis).
    n_outer = 2 if n_tiles >= 2 else 1
    n_inner = -(-n_tiles // n_outer)
    last_tile = n_tiles - 1

    pred_r = pred_f.reshape(N, C, S128, 128)
    tgt_r = tgt_f.reshape(N, S128, 128)

    def kernel(pred_ref, tgt_ref, ce_ref, vol_ref):
        i = pl.program_id(2)

        @pl.when(i == 0)
        def _():
            ce_ref[...] = jnp.zeros_like(ce_ref)
            vol_ref[...] = jnp.zeros_like(vol_ref)

        nc = pred_ref.shape[1]
        t = tgt_ref[0]                                # (tsub, 128) int32

        # Global flattened spatial index of every lane in this block; masks the
        # ragged last tile and any clamped/redundant block slots (no sentinel).
        u = pl.program_id(1) * n_inner + i            # unclamped tile index
        base = u * (tsub * 128)
        row = jax.lax.broadcasted_iota(jnp.int32, (tsub, 128), 0)
        lane = jax.lax.broadcasted_iota(jnp.int32, (tsub, 128), 1)
        valid = (base + row * 128 + lane) < S

        # Unrolled per-channel slabs: minor dims purely spatial -> full vregs.
        xs = [pred_ref[0, c].astype(jnp.float32) for c in range(nc)]

        if nc == 2:
            # Binary specialization: ce = softplus(+-(x1 - x0)), stable form.
            d = xs[1] - xs[0]
            z = jnp.where(t == 1, -d, d)
            ce_raw = jnp.maximum(z, 0.0) + jnp.log(1.0 + jnp.exp(-jnp.abs(z)))
            pred_nonzero = d > 0.0                    # argmax != 0 (first-max rule)
        else:
            m = xs[0]
            for c in range(1, nc):
                m = jnp.maximum(m, xs[c])
            se = jnp.exp(xs[0] - m)
            xt = xs[0]
            for c in range(1, nc):
                se = se + jnp.exp(xs[c] - m)
                xt = jnp.where(t == c, xs[c], xt)
            ce_raw = (m - xt) + jnp.log(se)           # -log softmax[target]
            pred_nonzero = m > xs[0]                  # argmax != 0 (first-max rule)

        ce = jnp.where(valid, ce_raw, 0.0)
        union = jnp.logical_and(valid, jnp.logical_or(t != 0, pred_nonzero))

        ce_ref[...] += ce[None, None]
        vol_ref[...] += union.astype(jnp.float32)[None, None]

    pred_spec = pl.BlockSpec(
        (1, C, tsub, 128),
        lambda n, o, i: (n, 0, jnp.minimum(o * n_inner + i, last_tile), 0))
    tgt_spec = pl.BlockSpec(
        (1, tsub, 128),
        lambda n, o, i: (n, jnp.minimum(o * n_inner + i, last_tile), 0))
    out_spec = pl.BlockSpec((1, 1, tsub, 128), lambda n, o, i: (n, o, 0, 0))

    # Explicit VMEM limit for the chosen tile (double-buffered inputs + resident
    # partials + temp headroom); bounded for v7x's smaller physical VMEM.
    in_block = C * tile_s * itemsize + tile_s * 4
    out_block = 2 * tile_s * 4
    vmem_bytes = 2 * in_block + 2 * out_block + 6 * tile_s * 4 + (2 << 20)
    vmem_bytes = int(min(max(vmem_bytes, 8 << 20), 48 << 20))

    part_sds = jax.ShapeDtypeStruct((N, n_outer, tsub, 128), jnp.float32)

    ce_part, vol_part = pl.pallas_call(
        kernel,
        out_shape=(part_sds, part_sds),
        grid_spec=pltpu.PrefetchScalarGridSpec(
            num_scalar_prefetch=0,
            grid=(N, n_outer, n_inner),
            in_specs=[pred_spec, tgt_spec],
            out_specs=[out_spec, out_spec],
        ),
        compiler_params=pltpu.CompilerParams(
            dimension_semantics=("parallel", "parallel", "arbitrary"),
            vmem_limit_bytes=vmem_bytes),
    )(pred_r, tgt_r)

    ce_sum = jnp.sum(ce_part)
    volume = jnp.sum(vol_part)
    # TODO(synk): volume == 0 gives inf/nan, matching the torch original.
    return ce_sum / (N * volume)


def _region_ce_ref(pred, target):
    """Pure-JAX reference for a correctness check."""
    N, C = pred.shape[0], pred.shape[1]
    S = int(np.prod(pred.shape[2:]))
    x = pred.reshape(N, C, S).astype(jnp.float32)
    t = target.reshape(N, S).astype(jnp.int32)
    logp = jax.nn.log_softmax(x, axis=1)
    ce = -jnp.take_along_axis(logp, t[:, None, :], axis=1)[:, 0, :]
    pred_cls = jnp.argmax(x, axis=1)
    volume = jnp.sum(jnp.logical_or(t != 0, pred_cls != 0).astype(jnp.float32))
    return jnp.sum(ce) / (N * volume)


if __name__ == "__main__":
    key = jax.random.PRNGKey(0)

    # Test 1: the canonical small shape (N=2, C=4, 16x16), default large tile.
    k1, k2, k3, k4, k5, k6 = jax.random.split(key, 6)
    pred1 = jax.random.normal(k1, (2, 4, 16, 16), dtype=jnp.float32)
    tgt1 = jax.random.randint(k2, (2, 16, 16), 0, 4, dtype=jnp.int32)
    loss1 = jax.jit(region_cross_entropy_loss)(pred1, tgt1)
    jax.block_until_ready(loss1)
    ref1 = _region_ce_ref(pred1, tgt1)
    assert jnp.allclose(loss1, ref1, atol=1e-4, rtol=1e-4), (loss1, ref1)

    # Test 2: 3-D volume, forced small tile -> multi-tile grid, megacore split,
    # ragged last block and one clamped excess slot (n_tiles = 3, grid 2x2).
    pred2 = jax.random.normal(k3, (1, 3, 5, 32, 32), dtype=jnp.float32)
    tgt2 = jax.random.randint(k4, (1, 5, 32, 32), 0, 3, dtype=jnp.int32)
    loss2 = jax.jit(
        lambda p, t: region_cross_entropy_loss(p, t, max_tile_elems=2048)
    )(pred2, tgt2)
    jax.block_until_ready(loss2)
    ref2 = _region_ce_ref(pred2, tgt2)
    assert jnp.allclose(loss2, ref2, atol=1e-4, rtol=1e-4), (loss2, ref2)

    # Test 3: binary (C=2) softplus path with S not a multiple of 128.
    pred3 = jax.random.normal(k5, (2, 2, 7, 9, 10), dtype=jnp.float32)
    tgt3 = jax.random.randint(k6, (2, 7, 9, 10), 0, 2, dtype=jnp.int32)
    loss3 = jax.jit(region_cross_entropy_loss)(pred3, tgt3)
    jax.block_until_ready(loss3)
    ref3 = _region_ce_ref(pred3, tgt3)
    assert jnp.allclose(loss3, ref3, atol=1e-4, rtol=1e-4), (loss3, ref3)

    print("KERNEL_OK")
</pallas_src>

<mosaic_0001>
module attributes {stable_mosaic.version = 11 : i64} {
  func.func @kernel(%arg0: i32, %arg1: i32, %arg2: i32, %arg3: memref<1x4x16x128xf32, #tpu.memory_space<vmem>>, %arg4: memref<1x16x128xi32, #tpu.memory_space<vmem>>, %arg5: memref<1x1x16x128xf32, #tpu.memory_space<vmem>>, %arg6: memref<1x1x16x128xf32, #tpu.memory_space<vmem>>) attributes {dimension_semantics = [#tpu.dimension_semantics<parallel>, #tpu.dimension_semantics<parallel>, #tpu.dimension_semantics<arbitrary>], iteration_bounds = array<i64: 2, 1, 1>, scalar_prefetch = 0 : i64, scratch_operands = 0 : i64, tpu.core_type = #tpu.core_type<tc>, window_params = [{transform_indices = @transform_0, window_bounds = array<i64: 1, 4, 16, 128>}, {transform_indices = @transform_1, window_bounds = array<i64: 1, 16, 128>}, {transform_indices = @transform_2, window_bounds = array<i64: 1, 1, 16, 128>}, {transform_indices = @transform_3, window_bounds = array<i64: 1, 1, 16, 128>}]} {
    %c0_i32 = arith.constant 0 : i32
    %0 = arith.cmpi eq, %arg2, %c0_i32 : i32
    %1 = arith.extui %0 : i1 to i32
    %c0_i32_0 = arith.constant 0 : i32
    %2 = arith.cmpi ne, %1, %c0_i32_0 : i32
    scf.if %2 {
      %cst_34 = arith.constant 0.000000e+00 : f32
      %68 = vector.broadcast %cst_34 : f32 to vector<1x1x16x128xf32>
      %c0_35 = arith.constant 0 : index
      %c0_36 = arith.constant 0 : index
      %c0_37 = arith.constant 0 : index
      %c0_38 = arith.constant 0 : index
      %69 = vector.load %arg5[%c0_35, %c0_36, %c0_37, %c0_38] : memref<1x1x16x128xf32, #tpu.memory_space<vmem>>, vector<1x1x16x128xf32>
      tpu.vector_store %arg5[%c0_35, %c0_36, %c0_37, %c0_38], %68 {strides = array<i32>} : memref<1x1x16x128xf32, #tpu.memory_space<vmem>>, vector<1x1x16x128xf32>,
      %cst_39 = arith.constant 0.000000e+00 : f32
      %70 = vector.broadcast %cst_39 : f32 to vector<1x1x16x128xf32>
      %c0_40 = arith.constant 0 : index
      %c0_41 = arith.constant 0 : index
      %c0_42 = arith.constant 0 : index
      %c0_43 = arith.constant 0 : index
      %71 = vector.load %arg6[%c0_40, %c0_41, %c0_42, %c0_43] : memref<1x1x16x128xf32, #tpu.memory_space<vmem>>, vector<1x1x16x128xf32>
      tpu.vector_store %arg6[%c0_40, %c0_41, %c0_42, %c0_43], %70 {strides = array<i32>} : memref<1x1x16x128xf32, #tpu.memory_space<vmem>>, vector<1x1x16x128xf32>,
    } else {
    }
    %c0 = arith.constant 0 : index
    %c0_1 = arith.constant 0 : index
    %c0_2 = arith.constant 0 : index
    %3 = vector.load %arg4[%c0, %c0_1, %c0_2] : memref<1x16x128xi32, #tpu.memory_space<vmem>>, vector<1x16x128xi32>
    %4 = vector.shape_cast %3 : vector<1x16x128xi32> to vector<16x128xi32>
    %c1_i32 = arith.constant 1 : i32
    %5 = arith.muli %arg1, %c1_i32 : i32
    %6 = arith.addi %5, %arg2 : i32
    %c2048_i32 = arith.constant 2048 : i32
    %7 = arith.muli %6, %c2048_i32 : i32
    %8 = tpu.iota {dimensions = array<i32: 0>} : vector<16x128xi32>
    %9 = tpu.iota {dimensions = array<i32: 1>} : vector<16x128xi32>
    %c128_i32 = arith.constant 128 : i32
    %10 = vector.broadcast %c128_i32 : i32 to vector<16x128xi32>
    %11 = arith.muli %8, %10 : vector<16x128xi32>
    %12 = vector.broadcast %7 : i32 to vector<16x128xi32>
    %13 = arith.addi %12, %11 : vector<16x128xi32>
    %14 = arith.addi %13, %9 : vector<16x128xi32>
    %c256_i32 = arith.constant 256 : i32
    %15 = vector.broadcast %c256_i32 : i32 to vector<16x128xi32>
    %16 = arith.cmpi slt, %14, %15 : vector<16x128xi32>
    %c0_3 = arith.constant 0 : index
    %c0_4 = arith.constant 0 : index
    %c0_5 = arith.constant 0 : index
    %c0_6 = arith.constant 0 : index
    %17 = vector.load %arg3[%c0_3, %c0_4, %c0_5, %c0_6] : memref<1x4x16x128xf32, #tpu.memory_space<vmem>>, vector<1x1x16x128xf32>
    %18 = vector.shape_cast %17 : vector<1x1x16x128xf32> to vector<16x128xf32>
    %c0_7 = arith.constant 0 : index
    %c1 = arith.constant 1 : index
    %c0_8 = arith.constant 0 : index
    %c0_9 = arith.constant 0 : index
    %19 = vector.load %arg3[%c0_7, %c1, %c0_8, %c0_9] : memref<1x4x16x128xf32, #tpu.memory_space<vmem>>, vector<1x1x16x128xf32>
    %20 = vector.shape_cast %19 : vector<1x1x16x128xf32> to vector<16x128xf32>
    %c0_10 = arith.constant 0 : index
    %c2 = arith.constant 2 : index
    %c0_11 = arith.constant 0 : index
    %c0_12 = arith.constant 0 : index
    %21 = vector.load %arg3[%c0_10, %c2, %c0_11, %c0_12] : memref<1x4x16x128xf32, #tpu.memory_space<vmem>>, vector<1x1x16x128xf32>
    %22 = vector.shape_cast %21 : vector<1x1x16x128xf32> to vector<16x128xf32>
    %c0_13 = arith.constant 0 : index
    %c3 = arith.constant 3 : index
    %c0_14 = arith.constant 0 : index
    %c0_15 = arith.constant 0 : index
    %23 = vector.load %arg3[%c0_13, %c3, %c0_14, %c0_15] : memref<1x4x16x128xf32, #tpu.memory_space<vmem>>, vector<1x1x16x128xf32>
    %24 = vector.shape_cast %23 : vector<1x1x16x128xf32> to vector<16x128xf32>
    %25 = arith.maximumf %18, %20 : vector<16x128xf32>
    %26 = arith.maximumf %25, %22 : vector<16x128xf32>
    %27 = arith.maximumf %26, %24 : vector<16x128xf32>
    %28 = arith.subf %18, %27 : vector<16x128xf32>
    %29 = math.exp %28 : vector<16x128xf32>
    %30 = arith.subf %20, %27 : vector<16x128xf32>
    %31 = math.exp %30 : vector<16x128xf32>
    %32 = arith.addf %29, %31 : vector<16x128xf32>
    %c1_i32_16 = arith.constant 1 : i32
    %33 = vector.broadcast %c1_i32_16 : i32 to vector<16x128xi32>
    %34 = arith.cmpi eq, %4, %33 : vector<16x128xi32>
    %35 = arith.select %34, %20, %18 : vector<16x128xi1>, vector<16x128xf32>
    %36 = arith.subf %22, %27 : vector<16x128xf32>
    %37 = math.exp %36 : vector<16x128xf32>
    %38 = arith.addf %32, %37 : vector<16x128xf32>
    %c2_i32 = arith.constant 2 : i32
    %39 = vector.broadcast %c2_i32 : i32 to vector<16x128xi32>
    %40 = arith.cmpi eq, %4, %39 : vector<16x128xi32>
    %41 = arith.select %40, %22, %35 : vector<16x128xi1>, vector<16x128xf32>
    %42 = arith.subf %24, %27 : vector<16x128xf32>
    %43 = math.exp %42 : vector<16x128xf32>
    %44 = arith.addf %38, %43 : vector<16x128xf32>
    %c3_i32 = arith.constant 3 : i32
    %45 = vector.broadcast %c3_i32 : i32 to vector<16x128xi32>
    %46 = arith.cmpi eq, %4, %45 : vector<16x128xi32>
    %47 = arith.select %46, %24, %41 : vector<16x128xi1>, vector<16x128xf32>
    %48 = arith.subf %27, %47 : vector<16x128xf32>
    %49 = math.log %44 : vector<16x128xf32>
    %50 = arith.addf %48, %49 : vector<16x128xf32>
    %51 = arith.cmpf ogt, %27, %18 : vector<16x128xf32>
    %cst = arith.constant 0.000000e+00 : f32
    %52 = vector.broadcast %cst : f32 to vector<16x128xf32>
    %53 = arith.select %16, %50, %52 : vector<16x128xi1>, vector<16x128xf32>
    %c0_i32_17 = arith.constant 0 : i32
    %54 = vector.broadcast %c0_i32_17 : i32 to vector<16x128xi32>
    %55 = arith.cmpi ne, %4, %54 : vector<16x128xi32>
    %56 = arith.ori %55, %51 : vector<16x128xi1>
    %57 = arith.andi %16, %56 : vector<16x128xi1>
    %c0_18 = arith.constant 0 : index
    %c0_19 = arith.constant 0 : index
    %c0_20 = arith.constant 0 : index
    %c0_21 = arith.constant 0 : index
    %58 = vector.load %arg5[%c0_18, %c0_19, %c0_20, %c0_21] : memref<1x1x16x128xf32, #tpu.memory_space<vmem>>, vector<1x1x16x128xf32>
    %59 = vector.shape_cast %53 : vector<16x128xf32> to vector<1x1x16x128xf32>
    %60 = arith.addf %58, %59 : vector<1x1x16x128xf32>
    %c0_22 = arith.constant 0 : index
    %c0_23 = arith.constant 0 : index
    %c0_24 = arith.constant 0 : index
    %c0_25 = arith.constant 0 : index
    %61 = vector.load %arg5[%c0_22, %c0_23, %c0_24, %c0_25] : memref<1x1x16x128xf32, #tpu.memory_space<vmem>>, vector<1x1x16x128xf32>
    tpu.vector_store %arg5[%c0_22, %c0_23, %c0_24, %c0_25], %60 {strides = array<i32>} : memref<1x1x16x128xf32, #tpu.memory_space<vmem>>, vector<1x1x16x128xf32>,
    %c0_26 = arith.constant 0 : index
    %c0_27 = arith.constant 0 : index
    %c0_28 = arith.constant 0 : index
    %c0_29 = arith.constant 0 : index
    %62 = vector.load %arg6[%c0_26, %c0_27, %c0_28, %c0_29] : memref<1x1x16x128xf32, #tpu.memory_space<vmem>>, vector<1x1x16x128xf32>
    %63 = arith.extui %57 : vector<16x128xi1> to vector<16x128xi32>
    %64 = arith.sitofp %63 : vector<16x128xi32> to vector<16x128xf32>
    %65 = vector.shape_cast %64 : vector<16x128xf32> to vector<1x1x16x128xf32>
    %66 = arith.addf %62, %65 : vector<1x1x16x128xf32>
    %c0_30 = arith.constant 0 : index
    %c0_31 = arith.constant 0 : index
    %c0_32 = arith.constant 0 : index
    %c0_33 = arith.constant 0 : index
    %67 = vector.load %arg6[%c0_30, %c0_31, %c0_32, %c0_33] : memref<1x1x16x128xf32, #tpu.memory_space<vmem>>, vector<1x1x16x128xf32>
    tpu.vector_store %arg6[%c0_30, %c0_31, %c0_32, %c0_33], %66 {strides = array<i32>} : memref<1x1x16x128xf32, #tpu.memory_space<vmem>>, vector<1x1x16x128xf32>,
    return
  }
  func.func @transform_0(%arg0: i32, %arg1: i32, %arg2: i32) -> (i32, i32, i32, i32) {
    %c1_i32 = arith.constant 1 : i32
    %0 = arith.muli %arg1, %c1_i32 : i32
    %1 = arith.addi %0, %arg2 : i32
    %c0_i32 = arith.constant 0 : i32
    %2 = arith.minsi %1, %c0_i32 : i32
    %c0_i32_0 = arith.constant 0 : i32
    %c0_i32_1 = arith.constant 0 : i32
    %c0_i32_2 = arith.constant 0 : i32
    return %arg0, %c0_i32_0, %2, %c0_i32_1 : i32, i32, i32, i32
  }
  func.func @transform_1(%arg0: i32, %arg1: i32, %arg2: i32) -> (i32, i32, i32) {
    %c1_i32 = arith.constant 1 : i32
    %0 = arith.muli %arg1, %c1_i32 : i32
    %1 = arith.addi %0, %arg2 : i32
    %c0_i32 = arith.constant 0 : i32
    %2 = arith.minsi %1, %c0_i32 : i32
    %c0_i32_0 = arith.constant 0 : i32
    %c0_i32_1 = arith.constant 0 : i32
    return %arg0, %2, %c0_i32_0 : i32, i32, i32
  }
  func.func @transform_2(%arg0: i32, %arg1: i32, %arg2: i32) -> (i32, i32, i32, i32) {
    %c0_i32 = arith.constant 0 : i32
    %c0_i32_0 = arith.constant 0 : i32
    %c0_i32_1 = arith.constant 0 : i32
    return %arg0, %arg1, %c0_i32, %c0_i32_0 : i32, i32, i32, i32
  }
  func.func @transform_3(%arg0: i32, %arg1: i32, %arg2: i32) -> (i32, i32, i32, i32) {
    %c0_i32 = arith.constant 0 : i32
    %c0_i32_0 = arith.constant 0 : i32
    %c0_i32_1 = arith.constant 0 : i32
    return %arg0, %arg1, %c0_i32, %c0_i32_0 : i32, i32, i32, i32
  }
}

</mosaic_0001>

<bundles_post_ra>
// kernel: region_cross_entropy_loss.1
= control target key start
LH: loop header
LB: loop body
LE: loop exit
PB: predicated region body
PF: predicated region fallthrough
CT: control target
= control target key end

     0   :  { %s716_s12 = smov 0   ;;  %s718_s13 = smov 0   ;;  %s840_s0 = inlined_call_operand.vmem [shape: f32[2,4,16,128], index: 0, kind: input, shape index: {}]   ;;  %s841_s1 = inlined_call_operand.vmem [shape: s32[2,16,128], index: 1, kind: input, shape index: {}]   ;;  %s842_s2 = inlined_call_operand.vmem [shape: f32[2,1,16,128], index: 2, kind: output, shape index: {0}]   ;;  %s843_s3 = inlined_call_operand.vmem [shape: f32[2,1,16,128], index: 3, kind: output, shape index: {1}]  }
   0x1   :  { %s720_s14 = smov 0  }
   0x2 LB: > { %s33_s15 = sadd.s32 1, %s689_s13  ;;  %p603_p0 = scmp.ge.s32.totalorder %s693_s14, 1  ;;  %s693_s14 = sphi %s720_s14, %s14_s14   ;;  %s689_s13 = sphi %s718_s13, %s845_s13   ;;  %s685_s12 = sphi %s716_s12, %s844_s12  }
   0x3   : > { %p35_p1 = scmp.ge.s32.totalorder %s33_s15, 2  ;;  %p211_p2 = scmp.lt.s32.totalorder %s693_s14, 3 }
   0x5   : > { %s847_s15 = smov (%p35_p1, %s33_s15), 0  ;;  %p212_p3 = pnand %p603_p0, %p211_p2 }
   0x6   : > { %p271_p4 = scmp.lt.s32.totalorder (!%p212_p3), %s685_s12, 1 }
   0x7   : > { %215 = sbr.rel (%p212_p3) target bundleno = 71 (0x47), region = 28 }
   0xc   : > { %v329_v0 = vlaneseq  ;;  %s849_s12 = smov (!%p271_p4, %s685_s12), 1  ;;  %v695_v40 = vmov 0.0  }
   0xd   : > { %s622_s16 = sshll.u32 %s849_s12, 6  ;;  %s743_s20 = sshll.u32 %s849_s12, 4 }
   0xe   : > { %v330_v1 = vshrl.u32 %v329_v0, 7  ;;  %s278_s19 = scalar_lea.vmem %s840_s0, %s622_s16  ;;  %v333_v10 = vand.u32 127, %v329_v0  ;;  %s294_s23 = scalar_lea.vmem %s841_s1, %s743_s20 }
   0xf   : > { %v737_v2 = vld [vmem:[%s278_s19] sm:$0xff]  ;;  %v739_v3 = vld [vmem:[%s278_s19 + $0x10] sm:$0xff]  ;;  %v747_v7 = vld [vmem:[%s278_s19 + $0x8] sm:$0xff]  ;;  %s316_s26 = scalar_lea.vmem %s843_s3, %s743_s20  ;;  %s307_s29 = scalar_lea.vmem %s842_s2, %s743_s20 }
  0x10   : > { %v741_v4 = vld [vmem:[%s278_s19 + $0x20] sm:$0xff]  ;;  %v331_v5 = vadd.s32 8, %v330_v1  ;;  %v354_v6 = vmax.f32 %v737_v2, %v739_v3  ;;  %v749_v8 = vld [vmem:[%s278_s19 + $0x18] sm:$0xff]  ;;  %v751_v9 = vld [vmem:[%s278_s19 + $0x28] sm:$0xff]  ;;  %v334_v11 = vmul.u32 128, %v330_v1 }
  0x11   : > { %v753_v12 = vld [vmem:[%s278_s19 + $0x30] sm:$0xff]  ;;  %v355_v13 = vmax.f32 %v747_v7, %v749_v8  ;;  %v758_v15 = vld [vmem:[%s278_s19 + $0x38] sm:$0xff]  ;;  %v773_v21 = vld [vmem:[%s294_s23] sm:$0xff] }
  0x12   : > { %v356_v14 = vmax.f32 %v354_v6, %v741_v4  ;;  %v335_v16 = vmul.u32 128, %v331_v5  ;;  %v768_v19 = vadd.s32 %v334_v11, %v333_v10  ;;  %vm414_vm0 = vcmp.ne.s32.totalorder %v773_v21, 0  ;;  %v326_v33 = vld [vmem:[%s294_s23 + $0x8] sm:$0xff] }
  0x13   : > { %v357_v17 = vmax.f32 %v355_v13, %v751_v9  ;;  %vm415_vm3 = vcmp.ne.s32.totalorder %v326_v33, 0  ;;  %vm374_vm10 = vcmp.eq.s32.totalorder %v773_v21, 1  ;;  %vm386_vm11 = vcmp.eq.s32.totalorder %v773_v21, 2 }
  0x14   : > { %v766_v18 = vmax.f32 %v356_v14, %v753_v12  ;;  %v783_v26 = vadd.s32 %v335_v16, %v333_v10  ;;  %vm341_vm1 = vcmp.lt.s32.totalorder %v768_v19, 256  ;;  %v376_v57 = vsel %vm374_vm10, %v739_v3, %v737_v2 }
  0x15   : > { %v771_v20 = vmax.f32 %v357_v17, %v758_v15  ;;  %vm375_vm12 = vcmp.eq.s32.totalorder %v326_v33, 1  ;;  %v388_v58 = vsel %vm386_vm11, %v741_v4, %v376_v57  ;;  %vm398_vm13 = vcmp.eq.s32.totalorder %v773_v21, 3 }
  0x16   : > { %v360_v22 = vsub.f32 %v737_v2, %v766_v18  ;;  %v366_v23 = vsub.f32 %v739_v3, %v766_v18  ;;  %v378_v24 = vsub.f32 %v741_v4, %v766_v18  ;;  %v390_v25 = vsub.f32 %v753_v12, %v766_v18 }
  0x17   : > { %v361_v27 = vsub.f32 %v747_v7, %v771_v20  ;;  %v367_v28 = vsub.f32 %v749_v8, %v771_v20  ;;  %v379_v32 = vsub.f32 %v751_v9, %v771_v20  ;;  %v391_v35 = vsub.f32 %v758_v15, %v771_v20 }
  0x18   : > { %v362_v29 = vmul.f32 1.442695, %v360_v22  ;;  %v368_v30 = vmul.f32 1.442695, %v366_v23  ;;  %v380_v31 = vmul.f32 1.442695, %v378_v24  ;;  %vm410_vm2 = vcmp.gt.f32.partialorder %v766_v18, %v737_v2 }
  0x19   : > { %v392_v34 = vmul.f32 1.442695, %v390_v25  ;;  %v364_v36 = vmul.f32 1.442695, %v361_v27  ;;  %vm342_vm4 = vcmp.lt.s32.totalorder %v783_v26, 256  ;;  %vm416_vm5 = vmor %vm414_vm0, %vm410_vm2  ;;  %vm411_vm6 = vcmp.gt.f32.partialorder %v771_v20, %v747_v7 }
  0x1a   : > { %651 = vpow2.f32 %v362_v29  ;;  %v370_v37 = vmul.f32 1.442695, %v367_v28  ;;  %v382_v38 = vmul.f32 1.442695, %v379_v32  ;;  %vm418_vm7 = vmand %vm341_vm1, %vm416_vm5  ;;  %v394_v39 = vmul.f32 1.442695, %v391_v35 }
  0x1b   : > { %653 = vpow2.f32 %v368_v30  ;;  %v618_v41 = vsel %vm418_vm7, 1.0, %v695_v40  ;;  %vm417_vm8 = vmor %vm415_vm3, %vm411_vm6  ;;  %v377_v59 = vsel %vm375_vm12, %v749_v8, %v747_v7  ;;  %vm387_vm14 = vcmp.eq.s32.totalorder %v326_v33, 2 }
  0x1c   : > { %655 = vpow2.f32 %v380_v31  ;;  %vm419_vm9 = vmand %vm342_vm4, %vm417_vm8  ;;  %434 = vst [vmem:[%s316_s26] sm:$0xff] %v618_v41  ;;  %v400_v60 = vsel %vm398_vm13, %v753_v12, %v388_v58  ;;  %v389_v61 = vsel %vm387_vm14, %v751_v9, %v377_v59  ;;  %vm399_vm15 = vcmp.eq.s32.totalorder %v326_v33, 3 }
  0x1d   : > { %657 = vpow2.f32 %v392_v34  ;;  %v619_v42 = vsel %vm419_vm9, 1.0, %v695_v40  ;;  %v402_v62 = vsub.f32 %v766_v18, %v400_v60  ;;  %v401_v0 = vsel %vm399_vm15, %v758_v15, %v389_v61 }
  0x1e   : > { %659 = vpow2.f32 %v364_v36  ;;  %435 = vst [vmem:[%s316_s26 + $0x8] sm:$0xff] %v619_v42  ;;  %v403_v3 = vsub.f32 %v771_v20, %v401_v0 }
  0x1f   : > { %661 = vpow2.f32 %v370_v37 }
  0x20   : > { %663 = vpow2.f32 %v382_v38 }
  0x21   : > { %665 = vpow2.f32 %v394_v39 }
  0x27   : > { %v652_v43 = vpop.eup %651 }
  0x28   : > { %v654_v44 = vpop.eup %653 }
  0x29   : > { %v656_v45 = vpop.eup %655  ;;  %v372_v46 = vadd.f32 %v654_v44, %v652_v43 }
  0x2a   : > { %v658_v47 = vpop.eup %657 }
  0x2b   : > { %v660_v48 = vpop.eup %659  ;;  %v384_v49 = vadd.f32 %v656_v45, %v372_v46 }
  0x2c   : > { %v662_v50 = vpop.eup %661 }
  0x2d   : > { %v664_v51 = vpop.eup %663  ;;  %v396_v52 = vadd.f32 %v658_v47, %v384_v49  ;;  %v373_v53 = vadd.f32 %v662_v50, %v660_v48 }
  0x2e   : > { %v666_v54 = vpop.eup %665 }
  0x2f   : > { %667 = vlog2.f32 %v396_v52  ;;  %v385_v55 = vadd.f32 %v664_v51, %v373_v53 }
  0x31   : > { %v397_v56 = vadd.f32 %v666_v54, %v385_v55 }
  0x33   : > { %669 = vlog2.f32 %v397_v56 }
  0x3c   : > { %v668_v63 = vpop.eup %667 }
  0x3d   : > { %v405_v1 = vmul.f32 0.6931472, %v668_v63 }
  0x3f   : > { %v408_v2 = vadd.f32 %v405_v1, %v402_v62 }
  0x40   : > { %v670_v4 = vpop.eup %669 }
  0x41   : > { %v412_v5 = vsel %vm341_vm1, %v408_v2, 0.0  ;;  %v407_v6 = vmul.f32 0.6931472, %v670_v4 }
  0x42   : > { %424 = vst [vmem:[%s307_s29] sm:$0xff] %v412_v5 }
  0x43   : > { %v409_v7 = vadd.f32 %v407_v6, %v403_v3 }
  0x45   : > { %v413_v8 = vsel %vm342_vm4, %v409_v7, 0.0 }
  0x46   : > { %425 = vst [vmem:[%s307_s29 + $0x8] sm:$0xff] %v413_v8 }
  0x47 PF: > { %s14_s14 = sadd.s32 1, %s693_s14   ;;  %s844_s12 = smov %s689_s13 }
  0x48   : > { %p11_p5 = scmp.ge.s32.totalorder %s14_s14, 4   ;;  %s845_s13 = smov %s847_s15 }
  0x4a   :  { %13 = sbr.rel (!%p11_p5) target bundleno = 2 (0x2), region = 80 }

</bundles_post_ra>
